<compile_context>
chip_gen: v7x
topology: tpu7x:2x2x1
jax: 0.10.0
libtpu: 0.0.40
codegen_flags: <defaults>
</compile_context>

<pallas_src>
import functools
import math

import jax
import jax.numpy as jnp
from jax.experimental import pallas as pl
from jax.experimental.pallas import tpu as pltpu

LANE = 128
# ~2 MiB of data per input per pipeline buffer (dtype-aware: 4096 f32 rows,
# 8192 bf16 rows).
TILE_BYTES_PER_INPUT = 2 * 1024 * 1024
# Cap on samples packed per grid step: each packed sample costs 3 arrays
# (a, c, out) x 2 buffers x 4 KiB of padded (.,8,128) VMEM = 24 KiB.
MAX_PACKED_SAMPLES = 256


def _samplewise_loss_kernel(a_ref, c_ref, fxt_ref, x0_ref, eps_ref, out_ref,
                            *, rows_total, rows_per_tile):
    """grid = (batch_tiles, row_tiles); output block is resident across the row axis."""
    r = pl.program_id(1)

    @pl.when(r == 0)
    def _init():
        out_ref[...] = jnp.zeros_like(out_ref)

    a = a_ref[...]                                # (TB,1,1) f32, broadcasts over rows/lanes
    c = c_ref[...]
    fxt = fxt_ref[...].astype(jnp.float32)        # stream native dtype, accumulate in f32
    x0 = x0_ref[...].astype(jnp.float32)
    eps = eps_ref[...].astype(jnp.float32)

    resid = fxt - (a * x0 + c * eps)
    sq = resid * resid

    def _accumulate(vals):
        # Rows (sublane axis) first: VPU vreg adds + one sublane reduce, then a
        # single cross-lane reduce per sample -> minimal XLU traffic per step.
        rows_sum = jnp.sum(vals, axis=1, keepdims=True)             # (TB, 1, LANE)
        out_ref[...] += jnp.sum(rows_sum, axis=2, keepdims=True)    # (TB, 1, 1)

    if rows_total % rows_per_tile != 0:
        last = pl.num_programs(1) - 1

        @pl.when(r != last)
        def _full():
            _accumulate(sq)

        @pl.when(r == last)
        def _tail():
            # Only the last row tile pays for the iota/compare/select.
            row_ids = jax.lax.broadcasted_iota(jnp.int32, sq.shape, 1)
            valid = row_ids < (rows_total - r * rows_per_tile)
            _accumulate(jnp.where(valid, sq, 0.0))
    else:
        _accumulate(sq)


def _choose_tiles(batch, rows, itemsize, tile_bytes):
    """Pick (TB samples, TR rows) per grid step."""
    rows_cap = max(8, tile_bytes // (LANE * itemsize))   # 4096 f32 / 8192 bf16 rows
    if rows >= rows_cap:
        tb, tr = 1, rows_cap                             # tile the reduction (row) axis
    else:
        tb = max(1, rows_cap // rows)                    # pack samples per grid step
        tb = min(tb, batch, MAX_PACKED_SAMPLES)
        # Keep >= min(B,4) batch tiles: both v7x TensorCores stream data and the
        # pipeline has several steps to overlap; also bounds padded coef/out VMEM.
        tb = min(tb, max(1, batch // min(batch, 4)))
        tr = rows
    # If the whole problem collapses into < 4 grid steps, split the row axis so the
    # BlockSpec pipeline has prefetch to overlap with compute (keep TR % 8 == 0).
    while (pl.cdiv(batch, tb) * pl.cdiv(rows, tr) < 4
           and tr % 16 == 0 and tr >= 128):
        tr //= 2
    return tb, tr


def _pallas_samplewise_loss(fxt, x0, eps, a_coef, c_coef,
                            tile_bytes=TILE_BYTES_PER_INPUT):
    B = fxt.shape[0]
    D = math.prod(fxt.shape[1:])
    # TODO(synk): pad/mask path for per-sample sizes that are not a multiple of 128 lanes.
    assert D % LANE == 0, "flattened per-sample size must be a multiple of 128"
    R = D // LANE
    itemsize = max(fxt.dtype.itemsize, x0.dtype.itemsize, eps.dtype.itemsize)
    TB, TR = _choose_tiles(B, R, itemsize, tile_bytes)

    f2 = fxt.reshape(B, R, LANE)
    x2 = x0.reshape(B, R, LANE)
    e2 = eps.reshape(B, R, LANE)
    a3 = a_coef.astype(jnp.float32).reshape(B, 1, 1)
    c3 = c_coef.astype(jnp.float32).reshape(B, 1, 1)

    data_spec = pl.BlockSpec((TB, TR, LANE), lambda b, r: (b, r, 0))
    coef_spec = pl.BlockSpec((TB, 1, 1), lambda b, r: (b, 0, 0))
    out_spec = pl.BlockSpec((TB, 1, 1), lambda b, r: (b, 0, 0))

    # VMEM budget: double-buffered data tiles + padded (TB,8,128) coef/out blocks
    # + headroom for compiler scratch.  Raising the limit explicitly keeps the
    # bigger tiles from tripping v5e's 16 MiB scoped default; 56 MiB cap stays
    # inside v7x's 64 MiB physical VMEM per TensorCore.
    data_bytes = 2 * TB * TR * LANE * (fxt.dtype.itemsize + x0.dtype.itemsize
                                       + eps.dtype.itemsize)
    small_bytes = 3 * 2 * TB * 8 * LANE * 4          # a, c, out padded blocks, 2 bufs
    vmem_limit = int(min(max(data_bytes + small_bytes + (8 << 20), 32 << 20),
                         56 << 20))

    bytes_accessed = int(B * D * (fxt.dtype.itemsize + x0.dtype.itemsize
                                  + eps.dtype.itemsize) + 3 * B * 4)

    kernel = functools.partial(_samplewise_loss_kernel,
                               rows_total=R, rows_per_tile=TR)

    out = pl.pallas_call(
        kernel,
        out_shape=jax.ShapeDtypeStruct((B, 1, 1), jnp.float32),
        grid=(pl.cdiv(B, TB), pl.cdiv(R, TR)),
        in_specs=[coef_spec, coef_spec, data_spec, data_spec, data_spec],
        out_specs=out_spec,
        compiler_params=pltpu.CompilerParams(
            dimension_semantics=("parallel", "arbitrary"),
            vmem_limit_bytes=vmem_limit,
        ),
        cost_estimate=pl.CostEstimate(
            flops=6 * B * D, transcendentals=0, bytes_accessed=bytes_accessed),
    )(a3, c3, f2, x2, e2)
    return out.reshape(B)


# --- deterministic cosine-schedule "sampler" ---------------------------------
# alpha(t) = cos(pi/2 t), sigma(t) = sin(pi/2 t)
def _alpha_prime(t):
    return -(math.pi / 2.0) * jnp.sin(math.pi / 2.0 * t)


def _sigma_prime(t):
    return (math.pi / 2.0) * jnp.cos(math.pi / 2.0 * t)


class SamplewiseDiffusionLoss:
    """JAX/Pallas re-implementation of the PyTorch module's forward pass."""

    def __init__(self, target_type: str = "V", tile_bytes: int = TILE_BYTES_PER_INPUT) -> None:
        if target_type == "SCORE":
            raise ValueError("Direct score matching is not supported.")
        assert target_type in ("X0", "EPS", "V")
        self.target_type = target_type
        self.tile_bytes = tile_bytes

    def _coeffs(self, t):
        ones = jnp.ones_like(t)
        zeros = jnp.zeros_like(t)
        if self.target_type == "X0":
            return ones, zeros
        if self.target_type == "EPS":
            return zeros, ones
        # V target: alpha'(t) * x0 + sigma'(t) * eps
        return _alpha_prime(t), _sigma_prime(t)

    def __call__(self, xt, fxt, x0, eps, t):
        # xt is part of the reference signature but unused by X0/EPS/V targets.
        a, c = self._coeffs(t.astype(jnp.float32))
        return _pallas_samplewise_loss(fxt, x0, eps, a, c, tile_bytes=self.tile_bytes)


def _reference_loss(target_type, fxt, x0, eps, t):
    B = fxt.shape[0]
    f32 = lambda v: v.astype(jnp.float32)
    if target_type == "X0":
        tgt = f32(x0)
    elif target_type == "EPS":
        tgt = f32(eps)
    else:
        shape = (B,) + (1,) * (fxt.ndim - 1)
        tgt = (_alpha_prime(t).reshape(shape) * f32(x0)
               + _sigma_prime(t).reshape(shape) * f32(eps))
    sq = (f32(fxt) - tgt) ** 2
    return jnp.sum(sq.reshape(B, -1), axis=1)


if __name__ == "__main__":
    key = jax.random.PRNGKey(0)
    ok = True

    # Case 1: tiny sample (R=8 rows), f32       -> TB=1 path, 2 grid steps.
    # Case 2: medium sample, bf16               -> packed path, row axis split to 4 steps.
    # Case 3: f32 with a reduced tile budget    -> row-tiled path with masked tail tile.
    # Case 4: batch=8 tiny samples, f32         -> packed path with TB>1 (2 samples/step).
    cases = [
        ((2, 4, 16, 16), jnp.float32, TILE_BYTES_PER_INPUT),
        ((2, 3, 256, 256), jnp.bfloat16, TILE_BYTES_PER_INPUT),
        ((2, 3, 64, 64), jnp.float32, 40 * LANE * 4),   # rows_cap=40 -> 3 row tiles, tail mask
        ((8, 4, 16, 16), jnp.float32, TILE_BYTES_PER_INPUT),
    ]

    for shape, dtype, tile_bytes in cases:
        B = shape[0]
        key, k_xt, k_fxt, k_x0, k_eps, k_t = jax.random.split(key, 6)
        xt = jax.random.normal(k_xt, shape, dtype=jnp.float32).astype(dtype)
        fxt = jax.random.normal(k_fxt, shape, dtype=jnp.float32).astype(dtype)
        x0 = jax.random.normal(k_x0, shape, dtype=jnp.float32).astype(dtype)
        eps = jax.random.normal(k_eps, shape, dtype=jnp.float32).astype(dtype)
        t = jax.random.uniform(k_t, (B,), dtype=jnp.float32)

        for target_type in ("X0", "EPS", "V"):
            loss_mod = SamplewiseDiffusionLoss(target_type, tile_bytes=tile_bytes)
            out = jax.block_until_ready(loss_mod(xt, fxt, x0, eps, t))
            ref = _reference_loss(target_type, fxt, x0, eps, t)
            if not jnp.allclose(out, ref, rtol=2e-4, atol=1e-2):
                ok = False

    if ok:
        print("KERNEL_OK")
</pallas_src>

<mosaic_0001>
module attributes {stable_mosaic.version = 11 : i64} {
  func.func @_samplewise_loss_kernel(%arg0: i32, %arg1: i32, %arg2: memref<1x1x1xf32, #tpu.memory_space<vmem>>, %arg3: memref<1x1x1xf32, #tpu.memory_space<vmem>>, %arg4: memref<1x8x128xf32, #tpu.memory_space<vmem>>, %arg5: memref<1x8x128xf32, #tpu.memory_space<vmem>>, %arg6: memref<1x8x128xf32, #tpu.memory_space<vmem>>, %arg7: memref<1x1x1xf32, #tpu.memory_space<vmem>>) attributes {dimension_semantics = [#tpu.dimension_semantics<parallel>, #tpu.dimension_semantics<arbitrary>], iteration_bounds = array<i64: 2, 1>, scalar_prefetch = 0 : i64, scratch_operands = 0 : i64, tpu.core_type = #tpu.core_type<tc>, window_params = [{transform_indices = @transform_0, window_bounds = array<i64: 1, 1, 1>}, {transform_indices = @transform_1, window_bounds = array<i64: 1, 1, 1>}, {transform_indices = @transform_2, window_bounds = array<i64: 1, 8, 128>}, {transform_indices = @transform_3, window_bounds = array<i64: 1, 8, 128>}, {transform_indices = @transform_4, window_bounds = array<i64: 1, 8, 128>}, {transform_indices = @transform_5, window_bounds = array<i64: 1, 1, 1>}]} {
    %c0_i32 = arith.constant 0 : i32
    %0 = arith.cmpi eq, %arg1, %c0_i32 : i32
    %1 = arith.extui %0 : i1 to i32
    %c0_i32_0 = arith.constant 0 : i32
    %2 = arith.cmpi ne, %1, %c0_i32_0 : i32
    scf.if %2 {
      %cst_22 = arith.constant 0.000000e+00 : f32
      %22 = vector.broadcast %cst_22 : f32 to vector<1x1x1xf32>
      %c0_23 = arith.constant 0 : index
      %c0_24 = arith.constant 0 : index
      %c0_25 = arith.constant 0 : index
      %23 = vector.load %arg7[%c0_23, %c0_24, %c0_25] : memref<1x1x1xf32, #tpu.memory_space<vmem>>, vector<1x1x1xf32>
      tpu.vector_store %arg7[%c0_23, %c0_24, %c0_25], %22 {strides = array<i32>} : memref<1x1x1xf32, #tpu.memory_space<vmem>>, vector<1x1x1xf32>,
    } else {
    }
    %c0 = arith.constant 0 : index
    %c0_1 = arith.constant 0 : index
    %c0_2 = arith.constant 0 : index
    %3 = vector.load %arg2[%c0, %c0_1, %c0_2] : memref<1x1x1xf32, #tpu.memory_space<vmem>>, vector<1x1x1xf32>
    %c0_3 = arith.constant 0 : index
    %c0_4 = arith.constant 0 : index
    %c0_5 = arith.constant 0 : index
    %4 = vector.load %arg3[%c0_3, %c0_4, %c0_5] : memref<1x1x1xf32, #tpu.memory_space<vmem>>, vector<1x1x1xf32>
    %c0_6 = arith.constant 0 : index
    %c0_7 = arith.constant 0 : index
    %c0_8 = arith.constant 0 : index
    %5 = vector.load %arg4[%c0_6, %c0_7, %c0_8] : memref<1x8x128xf32, #tpu.memory_space<vmem>>, vector<1x8x128xf32>
    %c0_9 = arith.constant 0 : index
    %c0_10 = arith.constant 0 : index
    %c0_11 = arith.constant 0 : index
    %6 = vector.load %arg5[%c0_9, %c0_10, %c0_11] : memref<1x8x128xf32, #tpu.memory_space<vmem>>, vector<1x8x128xf32>
    %c0_12 = arith.constant 0 : index
    %c0_13 = arith.constant 0 : index
    %c0_14 = arith.constant 0 : index
    %7 = vector.load %arg6[%c0_12, %c0_13, %c0_14] : memref<1x8x128xf32, #tpu.memory_space<vmem>>, vector<1x8x128xf32>
    %8 = vector.broadcast %3 : vector<1x1x1xf32> to vector<1x8x128xf32>
    %9 = arith.mulf %8, %6 : vector<1x8x128xf32>
    %10 = vector.broadcast %4 : vector<1x1x1xf32> to vector<1x8x128xf32>
    %11 = arith.mulf %10, %7 : vector<1x8x128xf32>
    %12 = arith.addf %9, %11 : vector<1x8x128xf32>
    %13 = arith.subf %5, %12 : vector<1x8x128xf32>
    %14 = arith.mulf %13, %13 : vector<1x8x128xf32>
    %cst = arith.constant dense<0.000000e+00> : vector<1x128xf32>
    %15 = vector.multi_reduction <add>, %14, %cst [1] : vector<1x8x128xf32> to vector<1x128xf32>
    %16 = vector.shape_cast %15 : vector<1x128xf32> to vector<1x1x128xf32>
    %c0_15 = arith.constant 0 : index
    %c0_16 = arith.constant 0 : index
    %c0_17 = arith.constant 0 : index
    %17 = vector.load %arg7[%c0_15, %c0_16, %c0_17] : memref<1x1x1xf32, #tpu.memory_space<vmem>>, vector<1x1x1xf32>
    %cst_18 = arith.constant dense<0.000000e+00> : vector<1x1xf32>
    %18 = vector.multi_reduction <add>, %16, %cst_18 [2] : vector<1x1x128xf32> to vector<1x1xf32>
    %19 = vector.shape_cast %18 : vector<1x1xf32> to vector<1x1x1xf32>
    %20 = arith.addf %17, %19 : vector<1x1x1xf32>
    %c0_19 = arith.constant 0 : index
    %c0_20 = arith.constant 0 : index
    %c0_21 = arith.constant 0 : index
    %21 = vector.load %arg7[%c0_19, %c0_20, %c0_21] : memref<1x1x1xf32, #tpu.memory_space<vmem>>, vector<1x1x1xf32>
    tpu.vector_store %arg7[%c0_19, %c0_20, %c0_21], %20 {strides = array<i32>} : memref<1x1x1xf32, #tpu.memory_space<vmem>>, vector<1x1x1xf32>,
    return
  }
  func.func @transform_0(%arg0: i32, %arg1: i32) -> (i32, i32, i32) {
    %c0_i32 = arith.constant 0 : i32
    %c0_i32_0 = arith.constant 0 : i32
    %c0_i32_1 = arith.constant 0 : i32
    return %arg0, %c0_i32, %c0_i32_0 : i32, i32, i32
  }
  func.func @transform_1(%arg0: i32, %arg1: i32) -> (i32, i32, i32) {
    %c0_i32 = arith.constant 0 : i32
    %c0_i32_0 = arith.constant 0 : i32
    %c0_i32_1 = arith.constant 0 : i32
    return %arg0, %c0_i32, %c0_i32_0 : i32, i32, i32
  }
  func.func @transform_2(%arg0: i32, %arg1: i32) -> (i32, i32, i32) {
    %c0_i32 = arith.constant 0 : i32
    %c0_i32_0 = arith.constant 0 : i32
    return %arg0, %arg1, %c0_i32 : i32, i32, i32
  }
  func.func @transform_3(%arg0: i32, %arg1: i32) -> (i32, i32, i32) {
    %c0_i32 = arith.constant 0 : i32
    %c0_i32_0 = arith.constant 0 : i32
    return %arg0, %arg1, %c0_i32 : i32, i32, i32
  }
  func.func @transform_4(%arg0: i32, %arg1: i32) -> (i32, i32, i32) {
    %c0_i32 = arith.constant 0 : i32
    %c0_i32_0 = arith.constant 0 : i32
    return %arg0, %arg1, %c0_i32 : i32, i32, i32
  }
  func.func @transform_5(%arg0: i32, %arg1: i32) -> (i32, i32, i32) {
    %c0_i32 = arith.constant 0 : i32
    %c0_i32_0 = arith.constant 0 : i32
    %c0_i32_1 = arith.constant 0 : i32
    return %arg0, %c0_i32, %c0_i32_0 : i32, i32, i32
  }
}

</mosaic_0001>

<bundles_post_ra>
// kernel: tpu_custom_call.1
= control target key start
LH: loop header
LB: loop body
LE: loop exit
PB: predicated region body
PF: predicated region fallthrough
CT: control target
= control target key end

     0   :  { %10 = vsyncpa [#allocation3], 0  ;;  %s932_s0 = inlined_call_operand.vmem [shape: f32[2,1,1], index: 0, kind: input, shape index: {}]   ;;  %s933_s1 = inlined_call_operand.vmem [shape: f32[2,1,1], index: 1, kind: input, shape index: {}]   ;;  %s934_s2 = inlined_call_operand.hbm [shape: f32[2,8,128], index: 2, kind: input, shape index: {}]   ;;  %s935_s3 = inlined_call_operand.vmem [shape: f32[2,8,128], index: 3, kind: input, shape index: {}]   ;;  %s936_s4 = inlined_call_operand.hbm [shape: f32[2,8,128], index: 4, kind: input, shape index: {}]   ;;  %s937_s5 = inlined_call_operand.vmem [shape: f32[2,1,1], index: 5, kind: output, shape index: {}]  }
   0x1   :  { %12 = vsyncpa [#allocation3 + $0x1], 0 }
   0x2   :  { %13 = vsyncpa [#allocation5], 0 }
   0x3   :  { %15 = vsyncpa [#allocation5 + $0x1], 0  ;;  %s749_s18 = smov 0   ;;  %s751_s19 = smov 0  }
   0x4   :  { %s753_s20 = smov 0   ;;  %s755_s21 = smov 0  }
   0x5   :  { %s757_s22 = smov 0   ;;  %s759_s23 = smov 0  }
   0x6 LB: > { %s520_s24 = sadd.s32 4294967295, %s713_s23   ;;  %s33_s25 = sadd.s32 1, %s709_s22  ;;  %s713_s23 = sphi %s759_s23, %s21_s23   ;;  %s709_s22 = sphi %s757_s22, %s951_s22   ;;  %s705_s21 = sphi %s755_s21, %s950_s21   ;;  %s701_s20 = sphi %s753_s20, %s949_s20   ;;  %s697_s19 = sphi %s751_s19, %s948_s19   ;;  %s693_s18 = sphi %s749_s18, %s947_s18  }
   0x7   : > { %p35_p0 = scmp.ge.s32.totalorder %s33_s25, 2  ;;  %s94_s26 = sadd.s32 1, %s701_s20 }
   0x8   : > { %p101_p1 = scmp.ne.s32.totalorder %s701_s20, %s697_s19  ;;  %p102_p2 = scmp.eq.s32.totalorder %s713_s23, 0 }
   0x9   : > { %s953_s25 = smov (%p35_p0, %s33_s25), 0  ;;  %p107_p4 = scmp.ne.s32.totalorder %s697_s19, %s693_s18 }
   0xa   : > { %p785_p3 = por %p102_p2, %p101_p1  ;;  %s89_s28 = ssub.s32 %s709_s22, %s953_s25 }
   0xb   : > { %p108_p5 = scmp.eq.s32.totalorder %s520_s24, 0  ;;  %p92_p6 = scmp.eq.s32.totalorder %s89_s28, 0 }
   0xc   : > { %p547_p8 = scmp.lt.s32.totalorder %s713_s23, 2  ;;  %s801_s6 = sand.u32 1, %s701_s20  }
   0xd   : > { %p792_p7 = por %p108_p5, %p107_p4  ;;  %s525_s7 = sshll.u32 %s709_s22, 7 }
   0xe   : > { %s798_s30 = scalar_select %p92_p6, %s701_s20, %s94_s26  }
   0xf   : > { %s940_s29 = scalar_select %p792_p7, 1, 0 }
  0x10   : > { %s524_s8 = sshll.u32 %s801_s6, 3  ;;  %s810_s11 = scalar_lea.hbm %s934_s2, %s525_s7 }
  0x11   : > { %s229_s12 = scalar_lea.vmem [#allocation2], %s524_s8  ;;  %p816_p9 = pnand %p547_p8, %p785_p3 }
  0x12   : > { %s237_s13 = sshll.u32 %s229_s12, 4  ;;  %s226_s15 = scalar_lea.sflag [#allocation3], %s801_s6  ;;  %s820_s13 = int_to_ptr.vmem [resolvable:$true] %s237_s13 }
  0x13   : > { %s599_s16 = scalar_lea.hbm %s810_s11, 128  ;;  %p601_p13 = pneg %p816_p9 }
  0x14   : > { %p600_p12 = scmp.ne.s32.totalorder %s810_s11, %s599_s16  ;;  %s604_s24 = scalar_lea.hbm %s934_s2, 256 }
  0x15   : > { %p605_p2 = scmp.lt.u32.totalorder %s810_s11, %s934_s2  ;;  %p606_p3 = scmp.lt.u32.totalorder %s604_s24, %s599_s16 }
  0x16   : > { %p602_p0 = pnand %p601_p13, %p600_p12  ;;  %p608_p5 = scmp.lt.u32.totalorder %s599_s16, %s810_s11 }
  0x17   : > { %p607_p4 = por %p606_p3, %p605_p2 }
  0x18   : > { %p603_p1 = pneg %p602_p0 }
  0x19   : > { %p609_p6 = por %p608_p5, %p607_p4 }
  0x1b   : > { %p610_p8 = pnand %p609_p6, %p603_p1 }
  0x1d   : > { %613 = shalt.err (!%p610_p8)
}
  0x1e   : > { %s614_s28 = scalar_lea.vmem %s820_s13, 128  ;;  %s715_s9 = smov [#allocation2]  }
  0x1f   : > { %p615_p12 = scmp.ne.s32.totalorder %s820_s13, %s614_s28  ;;  %s619_s10 = sshll.u32 %s715_s9, 4  ;;  %s620_s10 = int_to_ptr.vmem [resolvable:$false] %s619_s10 }
  0x20   : > { %s621_s12 = scalar_lea.vmem %s620_s10, 256  ;;  %p622_p11 = scmp.lt.s32.totalorder %s820_s13, %s620_s10 }
  0x21   : > { %p617_p0 = pnand %p615_p12, %p601_p13  ;;  %p623_p2 = scmp.lt.s32.totalorder %s621_s12, %s614_s28 }
  0x23   : > { %p618_p10 = pneg %p617_p0  ;;  %p624_p3 = por %p623_p2, %p622_p11 }
  0x25   : > { %p625_p4 = pnand %p624_p3, %p618_p10 }
  0x27   : > { %628 = shalt.err (!%p625_p4)
}
  0x28   : > { %543 = dma.hbm_to_vmem [thread:$0]  (!%p816_p9), %s810_s11, 128, %s820_s13, %s226_s15  }
  0x29   : > { %p942_p1 = scmp.lt.s32.totalorder %s713_s23, 3  ;;  %p943_p5 = scmp.ge.s32.totalorder %s713_s23, 1 }
  0x2a   : > { %s863_s24 = scalar_lea.hbm %s936_s4, %s525_s7  ;;  %s258_s26 = scalar_lea.vmem [#allocation4], %s524_s8 }
  0x2b   : > { %p854_p6 = pnand %p943_p5, %p942_p1  ;;  %s266_s27 = sshll.u32 %s258_s26, 4  ;;  %s267_s27 = int_to_ptr.vmem [resolvable:$true] %s266_s27 }
  0x2c   : > { %s255_s11 = scalar_lea.sflag [#allocation5], %s801_s6  ;;  %s629_s13 = scalar_lea.hbm %s863_s24, 128 }
  0x2d   : > { %s944_s16 = scalar_select %p854_p6, 1, 0 }
  0x2e   : > { %p630_p10 = scmp.ne.s32.totalorder %s863_s24, %s629_s13  ;;  %s634_s7 = scalar_lea.hbm %s936_s4, 256 }
  0x2f   : > { %p635_p12 = scmp.lt.u32.totalorder %s863_s24, %s936_s4  ;;  %p636_p0 = scmp.lt.u32.totalorder %s634_s7, %s629_s13 }
  0x30   : > { %p632_p11 = pnand %p630_p10, %p601_p13  ;;  %p638_p3 = scmp.lt.u32.totalorder %s629_s13, %s863_s24 }
  0x31   : > { %p637_p2 = por %p636_p0, %p635_p12 }
  0x32   : > { %p633_p8 = pneg %p632_p11 }
  0x33   : > { %p639_p4 = por %p638_p3, %p637_p2 }
  0x35   : > { %p640_p1 = pnand %p639_p4, %p633_p8 }
  0x37   : > { %643 = shalt.err (!%p640_p1)
}
  0x38   : > { %s644_s6 = scalar_lea.vmem %s267_s27, 128  ;;  %s716_s8 = smov [#allocation4]  }
  0x39   : > { %p645_p5 = scmp.ne.s32.totalorder %s267_s27, %s644_s6  ;;  %s649_s12 = sshll.u32 %s716_s8, 4  ;;  %s650_s12 = int_to_ptr.vmem [resolvable:$false] %s649_s12 }
  0x3a   : > { %s651_s17 = scalar_lea.vmem %s650_s12, 256  ;;  %p652_p7 = scmp.lt.s32.totalorder %s267_s27, %s650_s12 }
  0x3b   : > { %p647_p10 = pnand %p645_p5, %p601_p13  ;;  %p653_p6 = scmp.lt.s32.totalorder %s651_s17, %s644_s6 }
  0x3d   : > { %p648_p11 = pneg %p647_p10  ;;  %p654_p0 = por %p653_p6, %p652_p7 }
  0x3f   : > { %p655_p12 = pnand %p654_p0, %p648_p11 }
  0x41   : > { %658 = shalt.err (!%p655_p12)
}
  0x42   : > { %546 = dma.hbm_to_vmem [thread:$0]  (!%p816_p9), %s863_s24, 128, %s267_s27, %s255_s11  }
  0x43   : > { %p945_p8 = scmp.ne.s32.totalorder %s944_s16, 0 }
  0x44   : > { %s277_s18 = sand.u32 (!%p945_p8), 1, %s697_s19   ;;  %p946_p13 = scmp.ne.s32.totalorder (!%p945_p8), %s940_s29, 0 }
  0x45   : > { %275 = sbr.rel (%p945_p8) target bundleno = 381 (0x17d), region = 40  ;;  %s529_s26 = sshll.u32 (!%p945_p8), %s277_s18, 3 }
  0x46   : > { %s278_s13 = scalar_lea.sflag (!%p945_p8), [#allocation3], %s277_s18  ;;  %s281_s15 = scalar_lea.vmem (!%p945_p8), [#allocation2], %s529_s26 }
  0x4c   : > { %684 = dma.done.wait (%p946_p13), %s278_s13, 128  }
  0x4d   : > { %686 = vsyncadd (%p946_p13), %s278_s13, 4294967168  ;;  %s287_s28 = scalar_lea.sflag [#allocation5], %s277_s18  ;;  %s290_s7 = scalar_lea.vmem [#allocation4], %s529_s26 }
  0x4e   : > { %688 = dma.done.wait (%p946_p13), %s287_s28, 128  }
  0x4f   : > { %690 = vsyncadd (%p946_p13), %s287_s28, 4294967168  ;;  %p333_p7 = scmp.lt.s32.totalorder %s705_s21, 1  ;;  %v717_v0 = vmov 0   ;;  %vm353_vm0 = vcmask 0   ;;  %v718_v3 = vmov 0.0   ;;  %v359_v6 = vld [vmem:[%s290_s7] sm:$0xff] }
  0x50   : > { %598 = vset.pattern.permute.xlu0 %v717_v0  ;;  %v357_v10 = vld [vmem:[%s281_s15] sm:$0xff] }
  0x51   : > { %s955_s21 = smov (!%p333_p7, %s705_s21), 1 }
  0x52   : > { %s335_s24 = scalar_lea.vmem %s932_s0, %s955_s21  ;;  %s338_s9 = scalar_lea.vmem %s933_s1, %s955_s21 }
  0x53   : > { %v532_v1 = vld [vmem:[%s335_s24] ss:$0 sm:$0xff]  ;;  %s348_s6 = scalar_lea.vmem %s937_s5, %s955_s21  ;;  %s531_s8 = sshll.u32 %s955_s21, 3 }
  0x54   : > { %366 = vperm.xlu0 %598, %v532_v1   ;;  %v533_v2 = vld [vmem:[%s338_s9] ss:$0 sm:$0xff]  ;;  %354 = vst.msk [vmem:[%s348_s6] sm:$0x1] %vm353_vm0, %v718_v3  ;;  %s345_s18 = scalar_lea.vmem %s935_s3, %s531_s8 }
  0x55   : > { %v358_v5 = vld [vmem:[%s345_s18] sm:$0xff] }
  0x58   : > { %376 = vperm.xlu0 %598, %v533_v2  }
  0x5b   : > { %v389_v20 = vld [vmem:[%s348_s6] sm:$0x1] }
  0xd3   : > { %v367_v4 = vpop.permute.xlu0 %366 }
  0xd4   : > { %v369_v8 = vmul.f32 %v367_v4, %v358_v5 }
  0xd7   : > { %v377_v7 = vpop.permute.xlu0 %376 }
  0xd8   : > { %v379_v9 = vmul.f32 %v377_v7, %v359_v6 }
  0xda   : > { %v380_v11 = vadd.f32 %v379_v9, %v369_v8 }
  0xdc   : > { %v381_v12 = vsub.f32 %v357_v10, %v380_v11 }
  0xde   : > { %v382_v13 = vmul.f32 %v381_v12, %v381_v12 }
  0xe0   : > { %v383_v14 = vrot.slane %v382_v13, 4 }
  0xe2   : > { %v384_v15 = vadd.f32 %v383_v14, %v382_v13 }
  0xe4   : > { %v385_v16 = vrot.slane %v384_v15, 2 }
  0xe6   : > { %v386_v17 = vadd.f32 %v385_v16, %v384_v15 }
  0xe8   : > { %v387_v18 = vrot.slane %v386_v17, 1 }
  0xea   : > { %v388_v19 = vadd.f32 %v387_v18, %v386_v17 }
  0xec   : > { %390 = vadd.xlane.f32.xlu1 %v388_v19 }
 0x179   : > { %v391_v21 = vpop.xlane.xlu1 %390 }
 0x17a   : > { %v392_v22 = vadd.f32 %v391_v21, %v389_v20 }
 0x17c   : > { %394 = vst.msk [vmem:[%s348_s6] sm:$0x1] %vm353_vm0, %v392_v22 }
 0x17d PF: > { %s21_s23 = sadd.s32 1, %s713_s23   ;;  %s947_s18 = smov %s697_s19 }
 0x17e   : > { %p18_p9 = scmp.ge.s32.totalorder %s21_s23, 4   ;;  %s948_s19 = smov %s701_s20 }
 0x17f   : > { %s949_s20 = smov %s798_s30  ;;  %s950_s21 = smov %s709_s22 }
 0x180   : > { %s951_s22 = smov %s953_s25  ;;  %20 = sbr.rel (!%p18_p9) target bundleno = 6 (0x6), region = 106 }
 0x187   :  { %412 = vsyncpa [#allocation3], 1 }
 0x188   :  { %414 = vsyncpa [#allocation3 + $0x1], 1 }
 0x189   :  { %415 = vsyncpa [#allocation5], 1 }
 0x18a   :  { %417 = vsyncpa [#allocation5 + $0x1], 1 }

</bundles_post_ra>
